<compile_context>
chip_gen: v7x
topology: tpu7x:2x2x1
jax: 0.10.0
libtpu: 0.0.40
codegen_flags: <defaults>
</compile_context>

<pallas_src>
import jax
import jax.numpy as jnp
from jax import lax
from jax.experimental import pallas as pl
from jax.experimental.pallas import tpu as pltpu

IN_DIM = 784
HID_DIM = 200
HID_PAD = 256          # lane-dense hidden width (multiple of 128)
OUT_DIM = 10
OUT_PAD = 128          # lane-dense MXU N-tile for the second matmul
LN_EPS = 1e-5
LEAKY_SLOPE = 0.02


def _round_up(x, m):
    return ((x + m - 1) // m) * m


def classifier_kernel(x_ref, w1_ref, b1_ref, w2_ref, b2_ref, g_ref, beta_ref,
                      mask_ref, o_ref):
    # ---- Linear(784, 200->256 padded): bf16 operands, f32 accumulation ----
    x = x_ref[...].astype(jnp.bfloat16)                        # cast in-kernel
    h = jnp.dot(x, w1_ref[...],
                preferred_element_type=jnp.float32)            # (TB, 256) f32
    h = h + b1_ref[...]                                        # padded cols stay 0

    # ---- LeakyReLU(0.02) ----
    h = jnp.where(h >= 0, h, LEAKY_SLOPE * h)

    # ---- LayerNorm over the real 200 features (biased var, torch-style) ----
    inv_n = 1.0 / HID_DIM
    mean = jnp.sum(h, axis=-1, keepdims=True) * inv_n          # padded cols are 0
    centered = (h - mean) * mask_ref[...]                      # zero the pad lanes
    var = jnp.sum(centered * centered, axis=-1, keepdims=True) * inv_n
    hn = centered * lax.rsqrt(var + LN_EPS)
    hn = hn * g_ref[...] + beta_ref[...]                       # padded gamma/beta = 0

    # ---- Linear(200->256 padded, 10->128 padded) ----
    logits = jnp.dot(hn.astype(jnp.bfloat16), w2_ref[...],
                     preferred_element_type=jnp.float32)       # (TB, 128) f32
    logits = logits + b2_ref[...]

    # ---- Sigmoid on the 10 useful lanes: single EUP tanh ----
    lg = logits[:, :OUT_DIM]
    o_ref[...] = 0.5 * (jnp.tanh(0.5 * lg) + 1.0)


def pack_params(w1, b1, w2, b2, gamma, beta):
    """One-time padding/casting of the static parameters (hoisted out of the
    per-call path).  w1: (784,200), b1: (200,), w2: (200,10), b2: (10,),
    gamma/beta: (200,)."""
    w1_p = jnp.zeros((IN_DIM, HID_PAD), jnp.bfloat16).at[:, :HID_DIM].set(
        w1.astype(jnp.bfloat16))
    b1_p = jnp.zeros((1, HID_PAD), jnp.float32).at[:, :HID_DIM].set(
        b1.reshape(1, -1).astype(jnp.float32))
    g_p = jnp.zeros((1, HID_PAD), jnp.float32).at[:, :HID_DIM].set(
        gamma.reshape(1, -1).astype(jnp.float32))
    beta_p = jnp.zeros((1, HID_PAD), jnp.float32).at[:, :HID_DIM].set(
        beta.reshape(1, -1).astype(jnp.float32))
    w2_p = jnp.zeros((HID_PAD, OUT_PAD), jnp.bfloat16).at[
        :HID_DIM, :OUT_DIM].set(w2.astype(jnp.bfloat16))
    b2_p = jnp.zeros((1, OUT_PAD), jnp.float32).at[:, :OUT_DIM].set(
        b2.reshape(1, -1).astype(jnp.float32))
    mask = jnp.zeros((1, HID_PAD), jnp.float32).at[:, :HID_DIM].set(1.0)
    return (w1_p, b1_p, w2_p, b2_p, g_p, beta_p, mask)


def classifier_forward(x, params, *, block_b=2048):
    """x: (B, 784) float (f32 or bf16), params: result of pack_params().
    Returns (B, 10) f32."""
    w1_p, b1_p, w2_p, b2_p, g_p, beta_p, mask = params
    B = x.shape[0]

    # Batch tile: multiple of 8 sublanes; capped at ceil(B/2) (rounded up to 8)
    # so the grid has >= 2 steps whenever possible (v7x has 2 TensorCores).
    tb = max(8, min(block_b, _round_up(pl.cdiv(B, 2), 8)))
    grid = (pl.cdiv(B, tb),)       # partial last block; OOB writes are masked

    # Weights/biases: constant block index -> fetched once, stay VMEM-resident.
    resident = lambda shape: pl.BlockSpec(shape, lambda i: (0,) * len(shape))

    out = pl.pallas_call(
        classifier_kernel,
        out_shape=jax.ShapeDtypeStruct((B, OUT_DIM), jnp.float32),
        grid=grid,
        in_specs=[
            pl.BlockSpec((tb, IN_DIM), lambda i: (i, 0)),     # x: streamed
            resident((IN_DIM, HID_PAD)),                      # w1
            resident((1, HID_PAD)),                           # b1
            resident((HID_PAD, OUT_PAD)),                     # w2
            resident((1, OUT_PAD)),                           # b2
            resident((1, HID_PAD)),                           # gamma
            resident((1, HID_PAD)),                           # beta
            resident((1, HID_PAD)),                           # lane mask
        ],
        out_specs=pl.BlockSpec((tb, OUT_DIM), lambda i: (i, 0)),
        compiler_params=pltpu.CompilerParams(
            dimension_semantics=("parallel",),
            vmem_limit_bytes=48 * 1024 * 1024),
    )(x, w1_p, b1_p, w2_p, b2_p, g_p, beta_p, mask)

    return out


def reference_forward(x, w1, b1, w2, b2, gamma, beta):
    h = x @ w1 + b1
    h = jnp.where(h >= 0, h, LEAKY_SLOPE * h)
    mean = jnp.mean(h, axis=-1, keepdims=True)
    var = jnp.mean((h - mean) ** 2, axis=-1, keepdims=True)
    hn = (h - mean) / jnp.sqrt(var + LN_EPS)
    hn = hn * gamma + beta
    logits = hn @ w2 + b2
    return jax.nn.sigmoid(logits)


if __name__ == "__main__":
    key = jax.random.PRNGKey(0)
    kx, kw1, kb1, kw2, kb2 = jax.random.split(key, 5)

    B = 70  # deliberately NOT a multiple of the batch tile / sublane count
    x = jax.random.normal(kx, (B, IN_DIM), dtype=jnp.float32)

    # Torch-Linear-like uniform init, stored (in_features, out_features).
    bound1 = 1.0 / (IN_DIM ** 0.5)
    w1 = jax.random.uniform(kw1, (IN_DIM, HID_DIM), jnp.float32, -bound1, bound1)
    b1 = jax.random.uniform(kb1, (HID_DIM,), jnp.float32, -bound1, bound1)

    bound2 = 1.0 / (HID_DIM ** 0.5)
    w2 = jax.random.uniform(kw2, (HID_DIM, OUT_DIM), jnp.float32, -bound2, bound2)
    b2 = jax.random.uniform(kb2, (OUT_DIM,), jnp.float32, -bound2, bound2)

    # LayerNorm affine params (torch default init: gamma=1, beta=0).
    gamma = jnp.ones((HID_DIM,), jnp.float32)
    beta = jnp.zeros((HID_DIM,), jnp.float32)

    # One-time parameter packing (static across calls).
    params = pack_params(w1, b1, w2, b2, gamma, beta)

    # Small batch tile so the test exercises a multi-step grid + a partial
    # (masked) last block: tb=32 -> grid=3, last block has 6 valid rows.
    out = classifier_forward(x, params, block_b=32)
    out = jax.block_until_ready(out)

    ref = reference_forward(x, w1, b1, w2, b2, gamma, beta)
    assert out.shape == (B, OUT_DIM)
    # bf16 MXU operands -> deliberately looser tolerance than f32 bit-parity.
    assert jnp.allclose(out, ref, atol=2e-2, rtol=0), "mismatch vs reference"

    print("KERNEL_OK")
</pallas_src>

<mosaic_0001>
module attributes {stable_mosaic.version = 11 : i64} {
  func.func @classifier_kernel(%arg0: i32, %arg1: memref<32x784xf32, #tpu.memory_space<vmem>>, %arg2: memref<784x256xbf16, #tpu.memory_space<vmem>>, %arg3: memref<1x256xf32, #tpu.memory_space<vmem>>, %arg4: memref<256x128xbf16, #tpu.memory_space<vmem>>, %arg5: memref<1x128xf32, #tpu.memory_space<vmem>>, %arg6: memref<1x256xf32, #tpu.memory_space<vmem>>, %arg7: memref<1x256xf32, #tpu.memory_space<vmem>>, %arg8: memref<1x256xf32, #tpu.memory_space<vmem>>, %arg9: memref<32x10xf32, #tpu.memory_space<vmem>>) attributes {dimension_semantics = [#tpu.dimension_semantics<parallel>], iteration_bounds = array<i64: 3>, scalar_prefetch = 0 : i64, scratch_operands = 0 : i64, tpu.core_type = #tpu.core_type<tc>, window_params = [{transform_indices = @transform_0, window_bounds = array<i64: 32, 784>}, {pipeline_mode = #tpu.pipeline_mode<synchronous>, transform_indices = @transform_1, window_bounds = array<i64: 784, 256>}, {pipeline_mode = #tpu.pipeline_mode<synchronous>, transform_indices = @transform_2, window_bounds = array<i64: 1, 256>}, {pipeline_mode = #tpu.pipeline_mode<synchronous>, transform_indices = @transform_3, window_bounds = array<i64: 256, 128>}, {pipeline_mode = #tpu.pipeline_mode<synchronous>, transform_indices = @transform_4, window_bounds = array<i64: 1, 128>}, {pipeline_mode = #tpu.pipeline_mode<synchronous>, transform_indices = @transform_5, window_bounds = array<i64: 1, 256>}, {pipeline_mode = #tpu.pipeline_mode<synchronous>, transform_indices = @transform_6, window_bounds = array<i64: 1, 256>}, {pipeline_mode = #tpu.pipeline_mode<synchronous>, transform_indices = @transform_7, window_bounds = array<i64: 1, 256>}, {transform_indices = @transform_8, window_bounds = array<i64: 32, 10>}]} {
    %c0 = arith.constant 0 : index
    %c0_0 = arith.constant 0 : index
    %0 = vector.load %arg1[%c0, %c0_0] : memref<32x784xf32, #tpu.memory_space<vmem>>, vector<32x784xf32>
    %1 = arith.truncf %0 : vector<32x784xf32> to vector<32x784xbf16>
    %c0_1 = arith.constant 0 : index
    %c0_2 = arith.constant 0 : index
    %2 = vector.load %arg2[%c0_1, %c0_2] : memref<784x256xbf16, #tpu.memory_space<vmem>>, vector<784x256xbf16>
    %cst = arith.constant dense<0.000000e+00> : vector<32x256xf32>
    %3 = tpu.matmul %1, %2, %cst {dimension_numbers = #tpu.dot_dimension_numbers<[1], [0], [0], [1], [0, 0, 1, 1], [], []>} : vector<32x784xbf16>, vector<784x256xbf16>, vector<32x256xf32> -> vector<32x256xf32>
    %c0_3 = arith.constant 0 : index
    %c0_4 = arith.constant 0 : index
    %4 = vector.load %arg3[%c0_3, %c0_4] : memref<1x256xf32, #tpu.memory_space<vmem>>, vector<1x256xf32>
    %5 = vector.broadcast %4 : vector<1x256xf32> to vector<32x256xf32>
    %6 = arith.addf %3, %5 : vector<32x256xf32>
    %cst_5 = arith.constant 0.000000e+00 : f32
    %7 = vector.broadcast %cst_5 : f32 to vector<32x256xf32>
    %8 = arith.cmpf oge, %6, %7 : vector<32x256xf32>
    %cst_6 = arith.constant 2.000000e-02 : f32
    %9 = vector.broadcast %cst_6 : f32 to vector<32x256xf32>
    %10 = arith.mulf %9, %6 : vector<32x256xf32>
    %11 = arith.select %8, %6, %10 : vector<32x256xi1>, vector<32x256xf32>
    %cst_7 = arith.constant dense<0.000000e+00> : vector<32xf32>
    %12 = vector.multi_reduction <add>, %11, %cst_7 [1] : vector<32x256xf32> to vector<32xf32>
    %13 = vector.shape_cast %12 : vector<32xf32> to vector<32x1xf32>
    %cst_8 = arith.constant 5.000000e-03 : f32
    %14 = vector.broadcast %cst_8 : f32 to vector<32x1xf32>
    %15 = arith.mulf %13, %14 : vector<32x1xf32>
    %16 = vector.broadcast %15 : vector<32x1xf32> to vector<32x256xf32>
    %17 = arith.subf %11, %16 : vector<32x256xf32>
    %c0_9 = arith.constant 0 : index
    %c0_10 = arith.constant 0 : index
    %18 = vector.load %arg8[%c0_9, %c0_10] : memref<1x256xf32, #tpu.memory_space<vmem>>, vector<1x256xf32>
    %19 = vector.broadcast %18 : vector<1x256xf32> to vector<32x256xf32>
    %20 = arith.mulf %17, %19 : vector<32x256xf32>
    %21 = arith.mulf %20, %20 : vector<32x256xf32>
    %cst_11 = arith.constant dense<0.000000e+00> : vector<32xf32>
    %22 = vector.multi_reduction <add>, %21, %cst_11 [1] : vector<32x256xf32> to vector<32xf32>
    %23 = vector.shape_cast %22 : vector<32xf32> to vector<32x1xf32>
    %cst_12 = arith.constant 5.000000e-03 : f32
    %24 = vector.broadcast %cst_12 : f32 to vector<32x1xf32>
    %25 = arith.mulf %23, %24 : vector<32x1xf32>
    %cst_13 = arith.constant 9.99999974E-6 : f32
    %26 = vector.broadcast %cst_13 : f32 to vector<32x1xf32>
    %27 = arith.addf %25, %26 : vector<32x1xf32>
    %28 = math.rsqrt %27 : vector<32x1xf32>
    %29 = vector.broadcast %28 : vector<32x1xf32> to vector<32x256xf32>
    %30 = arith.mulf %20, %29 : vector<32x256xf32>
    %c0_14 = arith.constant 0 : index
    %c0_15 = arith.constant 0 : index
    %31 = vector.load %arg6[%c0_14, %c0_15] : memref<1x256xf32, #tpu.memory_space<vmem>>, vector<1x256xf32>
    %32 = vector.broadcast %31 : vector<1x256xf32> to vector<32x256xf32>
    %33 = arith.mulf %30, %32 : vector<32x256xf32>
    %c0_16 = arith.constant 0 : index
    %c0_17 = arith.constant 0 : index
    %34 = vector.load %arg7[%c0_16, %c0_17] : memref<1x256xf32, #tpu.memory_space<vmem>>, vector<1x256xf32>
    %35 = vector.broadcast %34 : vector<1x256xf32> to vector<32x256xf32>
    %36 = arith.addf %33, %35 : vector<32x256xf32>
    %37 = arith.truncf %36 : vector<32x256xf32> to vector<32x256xbf16>
    %c0_18 = arith.constant 0 : index
    %c0_19 = arith.constant 0 : index
    %38 = vector.load %arg4[%c0_18, %c0_19] : memref<256x128xbf16, #tpu.memory_space<vmem>>, vector<256x128xbf16>
    %cst_20 = arith.constant dense<0.000000e+00> : vector<32x128xf32>
    %39 = tpu.matmul %37, %38, %cst_20 {dimension_numbers = #tpu.dot_dimension_numbers<[1], [0], [0], [1], [0, 0, 1, 1], [], []>} : vector<32x256xbf16>, vector<256x128xbf16>, vector<32x128xf32> -> vector<32x128xf32>
    %c0_21 = arith.constant 0 : index
    %c0_22 = arith.constant 0 : index
    %40 = vector.load %arg5[%c0_21, %c0_22] : memref<1x128xf32, #tpu.memory_space<vmem>>, vector<1x128xf32>
    %41 = vector.broadcast %40 : vector<1x128xf32> to vector<32x128xf32>
    %42 = arith.addf %39, %41 : vector<32x128xf32>
    %43 = vector.extract_strided_slice %42 {offsets = [0, 0], sizes = [32, 10], strides = [1, 1]} : vector<32x128xf32> to vector<32x10xf32>
    %cst_23 = arith.constant 5.000000e-01 : f32
    %44 = vector.broadcast %cst_23 : f32 to vector<32x10xf32>
    %45 = arith.mulf %44, %43 : vector<32x10xf32>
    %46 = math.tanh %45 : vector<32x10xf32>
    %cst_24 = arith.constant 1.000000e+00 : f32
    %47 = vector.broadcast %cst_24 : f32 to vector<32x10xf32>
    %48 = arith.addf %46, %47 : vector<32x10xf32>
    %cst_25 = arith.constant 5.000000e-01 : f32
    %49 = vector.broadcast %cst_25 : f32 to vector<32x10xf32>
    %50 = arith.mulf %49, %48 : vector<32x10xf32>
    %c0_26 = arith.constant 0 : index
    %c0_27 = arith.constant 0 : index
    %51 = vector.load %arg9[%c0_26, %c0_27] : memref<32x10xf32, #tpu.memory_space<vmem>>, vector<32x10xf32>
    tpu.vector_store %arg9[%c0_26, %c0_27], %50 {strides = array<i32>} : memref<32x10xf32, #tpu.memory_space<vmem>>, vector<32x10xf32>,
    return
  }
  func.func @transform_0(%arg0: i32) -> (i32, i32) {
    %c0_i32 = arith.constant 0 : i32
    %c0_i32_0 = arith.constant 0 : i32
    return %arg0, %c0_i32 : i32, i32
  }
  func.func @transform_1(%arg0: i32) -> (i32, i32) {
    %c0_i32 = arith.constant 0 : i32
    %c0_i32_0 = arith.constant 0 : i32
    %c0_i32_1 = arith.constant 0 : i32
    return %c0_i32, %c0_i32_0 : i32, i32
  }
  func.func @transform_2(%arg0: i32) -> (i32, i32) {
    %c0_i32 = arith.constant 0 : i32
    %c0_i32_0 = arith.constant 0 : i32
    %c0_i32_1 = arith.constant 0 : i32
    return %c0_i32, %c0_i32_0 : i32, i32
  }
  func.func @transform_3(%arg0: i32) -> (i32, i32) {
    %c0_i32 = arith.constant 0 : i32
    %c0_i32_0 = arith.constant 0 : i32
    %c0_i32_1 = arith.constant 0 : i32
    return %c0_i32, %c0_i32_0 : i32, i32
  }
  func.func @transform_4(%arg0: i32) -> (i32, i32) {
    %c0_i32 = arith.constant 0 : i32
    %c0_i32_0 = arith.constant 0 : i32
    %c0_i32_1 = arith.constant 0 : i32
    return %c0_i32, %c0_i32_0 : i32, i32
  }
  func.func @transform_5(%arg0: i32) -> (i32, i32) {
    %c0_i32 = arith.constant 0 : i32
    %c0_i32_0 = arith.constant 0 : i32
    %c0_i32_1 = arith.constant 0 : i32
    return %c0_i32, %c0_i32_0 : i32, i32
  }
  func.func @transform_6(%arg0: i32) -> (i32, i32) {
    %c0_i32 = arith.constant 0 : i32
    %c0_i32_0 = arith.constant 0 : i32
    %c0_i32_1 = arith.constant 0 : i32
    return %c0_i32, %c0_i32_0 : i32, i32
  }
  func.func @transform_7(%arg0: i32) -> (i32, i32) {
    %c0_i32 = arith.constant 0 : i32
    %c0_i32_0 = arith.constant 0 : i32
    %c0_i32_1 = arith.constant 0 : i32
    return %c0_i32, %c0_i32_0 : i32, i32
  }
  func.func @transform_8(%arg0: i32) -> (i32, i32) {
    %c0_i32 = arith.constant 0 : i32
    %c0_i32_0 = arith.constant 0 : i32
    return %arg0, %c0_i32 : i32, i32
  }
}

</mosaic_0001>

<bundles_post_ra>
// kernel: tpu_custom_call.1
= control target key start
LH: loop header
LB: loop body
LE: loop exit
PB: predicated region body
PF: predicated region fallthrough
CT: control target
= control target key end

     0   :  { %13 = vsyncpa [#allocation3], 0  ;;  %s2945_s0 = inlined_call_operand.hbm [shape: f32[70,784], index: 0, kind: input, shape index: {}]   ;;  %s2946_s1 = inlined_call_operand.hbm [shape: bf16[784,256], index: 1, kind: input, shape index: {}]   ;;  %s2947_s2 = inlined_call_operand.vmem [shape: f32[1,256], index: 2, kind: input, shape index: {}]   ;;  %s2948_s3 = inlined_call_operand.hbm [shape: bf16[256,128], index: 3, kind: input, shape index: {}]   ;;  %s2949_s4 = inlined_call_operand.vmem [shape: f32[1,128], index: 4, kind: input, shape index: {}]   ;;  %s2950_s5 = inlined_call_operand.vmem [shape: f32[1,256], index: 5, kind: input, shape index: {}]   ;;  %s2951_s6 = inlined_call_operand.vmem [shape: f32[1,256], index: 6, kind: input, shape index: {}]   ;;  %s2952_s7 = inlined_call_operand.vmem [shape: f32[1,256], index: 7, kind: input, shape index: {}]   ;;  %s2953_s8 = inlined_call_operand.vmem [shape: f32[70,10], index: 8, kind: output, shape index: {}]  }
   0x1   :  { %15 = vsyncpa [#allocation3 + $0x1], 0 }
   0x2   :  { %16 = vsyncpa [#allocation5], 0  ;;  %s2607_s27 = smov 0   ;;  %s2609_s28 = smov 0  }
   0x3   :  { %s2611_s29 = smov 0   ;;  %s2613_s30 = smov 0  }
   0x4 LB: > { %s2626_s9 = sadd.s32 4294967295, %s2518_s30   ;;  %s2629_s10 = sadd.s32 1, %s2518_s30   ;;  %s2518_s30 = sphi %s2613_s30, %s2975_s30   ;;  %s2514_s29 = sphi %s2611_s29, %s2979_s29   ;;  %s2510_s28 = sphi %s2609_s28, %s2978_s28   ;;  %s2506_s27 = sphi %s2607_s27, %s2977_s27  }
   0x5   : > { %2959 = sst [smem:[#allocation10_spill]] %s2629_s10  ;;  %s26_s11 = ssub.s32 %s2518_s30, %s2629_s10 }
   0x6   : > { %s29_s12 = sadd.s32 1, %s2514_s29  ;;  %p27_p0 = scmp.eq.s32.totalorder %s26_s11, 0 }
   0x7   : > { %p36_p1 = scmp.ne.s32.totalorder %s2514_s29, %s2510_s28  ;;  %p37_p2 = scmp.eq.s32.totalorder %s2518_s30, 0 }
   0x8   : > { %p42_p3 = scmp.ne.s32.totalorder %s2510_s28, %s2506_s27  ;;  %p2954_p5 = scmp.eq.s32.totalorder %s2626_s9, 0 }
   0x9   : > { %s2639_s13 = scalar_select %p27_p0, %s2514_s29, %s29_s12  }
   0xa   : > { %p2641_p4 = por %p37_p2, %p36_p1  ;;  %p213_p6 = scmp.eq.s32.totalorder %s2626_s9, 2 }
   0xb   : > { %2960 = sst [smem:[#allocation11_spill]] %s2639_s13  ;;  %p1845_p7 = scmp.ge.s32.totalorder %s2518_s30, 1 }
   0xc   : > { %s2961_s14 = scalar_select %p2641_p4, 1, 0 }
   0xd   : > { %p2650_p8 = por %p2954_p5, %p42_p3  ;;  %p226_p9 = scmp.lt.s32.totalorder %s2518_s30, 4 }
   0xe   : > { %p2655_p10 = por %p213_p6, %p36_p1  ;;  %s2552_s18 = smov [#allocation4]  }
   0xf   : > { %s2962_s15 = scalar_select %p2650_p8, 1, 0 }
  0x10   : > { %s2963_s16 = scalar_select %p2655_p10, 1, 0 }
  0x11   : > { %p2659_p11 = pnand %p1845_p7, %p226_p9  ;;  %s238_s19 = sshll.u32 %s2552_s18, 4  ;;  %s239_s19 = int_to_ptr.vmem [resolvable:$true] %s238_s19 }
  0x12   : > { %s2553_s21 = smov [#allocation6]   ;;  %s2364_s25 = scalar_lea.hbm %s2946_s1, 12544 }
  0x13   : > { %s2964_s17 = scalar_select %p2659_p11, 1, 0 }
  0x14   : > { %p2069_p12 = pneg %p2659_p11  ;;  %s254_s22 = sshll.u32 %s2553_s21, 4  ;;  %s2671_s22 = int_to_ptr.vmem [resolvable:$true] %s254_s22 }
  0x15   : > { %p2365_p0 = scmp.ne.s32.totalorder %s2946_s1, %s2364_s25  ;;  %p2371_p6 = scmp.lt.u32.totalorder %s2364_s25, %s2946_s1 }
  0x16   : > { %p2667_p13 = pnand %p2069_p12, %p2954_p5 }
  0x18   : > { %p2366_p1 = pneg %p2667_p13 }
  0x1a   : > { %p2367_p2 = pnand %p2366_p1, %p2365_p0 }
  0x1c   : > { %p2368_p3 = pneg %p2367_p2 }
  0x1e   : > { %p2373_p7 = pnand %p2371_p6, %p2368_p3 }
  0x20   : > { %2376 = shalt.err (!%p2373_p7)
}
  0x21   : > { %s2377_s18 = scalar_lea.vmem %s239_s19, 12544  ;;  %p2385_p10 = scmp.lt.s32.totalorder %s239_s19, %s239_s19 }
  0x22   : > { %p2378_p9 = scmp.ne.s32.totalorder %s239_s19, %s2377_s18  ;;  %p2386_p8 = scmp.lt.s32.totalorder %s2377_s18, %s2377_s18 }
  0x24   : > { %p2380_p12 = pnand %p2378_p9, %p2366_p1  ;;  %p2387_p11 = por %p2386_p8, %p2385_p10 }
  0x26   : > { %p2381_p5 = pneg %p2380_p12 }
  0x28   : > { %p2388_p4 = pnand %p2387_p11, %p2381_p5 }
  0x2a   : > { %2391 = shalt.err (!%p2388_p4)
}
  0x2b   : > { %s2554_s21 = smov 128   ;;  %s2555_s23 = smov 8  }
  0x2c   : > { %2072 = dma.hbm_to_vmem [thread:$0]  (!%p2667_p13), %s2946_s1, 12544, %s239_s19, [#allocation5], %s2554_s21, %s2554_s21, %s2555_s23  }
  0x2d   : > { %s2392_s11 = scalar_lea.hbm %s2948_s3, 2048 }
  0x2e   : > { %p2393_p0 = scmp.ne.s32.totalorder %s2948_s3, %s2392_s11  ;;  %p2399_p8 = scmp.lt.u32.totalorder %s2392_s11, %s2948_s3 }
  0x30   : > { %p2395_p4 = pnand %p2393_p0, %p2366_p1 }
  0x32   : > { %p2396_p5 = pneg %p2395_p4 }
  0x34   : > { %p2401_p10 = pnand %p2399_p8, %p2396_p5 }
  0x36   : > { %2404 = shalt.err (!%p2401_p10)
}
  0x37   : > { %s2405_s19 = scalar_lea.vmem %s2671_s22, 2048  ;;  %p2413_p6 = scmp.lt.s32.totalorder %s2671_s22, %s2671_s22 }
  0x38   : > { %p2406_p11 = scmp.ne.s32.totalorder %s2671_s22, %s2405_s19  ;;  %p2414_p7 = scmp.lt.s32.totalorder %s2405_s19, %s2405_s19 }
  0x3a   : > { %p2408_p2 = pnand %p2406_p11, %p2366_p1  ;;  %p2415_p9 = por %p2414_p7, %p2413_p6 }
  0x3c   : > { %p2409_p3 = pneg %p2408_p2 }
  0x3e   : > { %p2416_p12 = pnand %p2415_p9, %p2409_p3 }
  0x40   : > { %2419 = shalt.err (!%p2416_p12)
}
  0x41   : > { %s2556_s10 = smov 64   ;;  %s2557_s13 = smov 4  }
  0x42   : > { %2075 = dma.hbm_to_vmem [thread:$0]  (!%p2667_p13), %s2948_s3, 2048, %s2671_s22, [#allocation5], %s2556_s10, %s2556_s10, %s2557_s13  }
  0x43   : > { %p1848_p0 = scmp.ge.s32.totalorder %s2518_s30, 3 }
  0x44   : > { %p2966_p1 = scmp.ne.s32.totalorder (!%p1848_p0), %s2961_s14, 0 }
  0x45   : > { %276 = sbr.rel (%p1848_p0) target bundleno = 112 (0x70), region = 44 }
  0x4c   : > { %279 = sbr.rel (!%p2966_p1) target bundleno = 112 (0x70), region = 48  ;;  %s280_s24 = sand.u32 (%p2966_p1), 1, %s2514_s29  }
  0x4d   : > { %s1849_s25 = sshll.u32 (%p2966_p1), %s2518_s30, 2  ;;  %s2057_s26 = smul.u32 (%p2966_p1), 224, %s280_s24 }
  0x4e   : > { %s286_s27 = ssub.s32 (%p2966_p1), 9, %s1849_s25  ;;  %s2728_s12 = scalar_lea.sflag (%p2966_p1), [#allocation3], %s280_s24 }
  0x4f   : > { %p287_p4 = scmp.lt.s32.totalorder (%p2966_p1), %s286_s27, 4  ;;  %s284_s22 = scalar_lea.vmem (%p2966_p1), [#allocation2], %s2057_s26 }
  0x53   : > { %s2981_s27 = smov (!%p287_p4, %s286_s27), 4 }
  0x54   : > { %s2725_s11 = smul.u32 896, %s2981_s27 }
  0x56   : > { %s292_s20 = ssub.s32 3584, %s2725_s11 }
  0x57   : > { %293 = vsyncadd %s2728_s12, %s292_s20  ;;  %p1852_p13 = scmp.ne.s32.totalorder %s2725_s11, 0  ;;  %s2058_s14 = smul.u32 3584, %s2518_s30 }
  0x58   : > { %s299_s18 = sshll.u32 %s284_s22, 4  ;;  %s2424_s30 = scalar_lea.hbm %s2945_s0, 8064  ;;  %s2738_s18 = int_to_ptr.vmem [resolvable:$true] %s299_s18 }
  0x59   : > { %s2736_s13 = scalar_lea.hbm %s2945_s0, %s2058_s14 }
  0x5a   : > { %s2420_s21 = scalar_lea.hbm %s2736_s13, %s2725_s11  ;;  %p2425_p11 = scmp.lt.u32.totalorder %s2736_s13, %s2945_s0 }
  0x5b   : > { %p2421_p5 = scmp.ne.s32.totalorder %s2736_s13, %s2420_s21  ;;  %p2426_p2 = scmp.lt.u32.totalorder %s2424_s30, %s2420_s21 }
  0x5c   : > { %p2428_p6 = scmp.lt.u32.totalorder %s2420_s21, %s2736_s13 }
  0x5d   : > { %p2422_p8 = pnand %p2421_p5, %p1852_p13  ;;  %p2427_p3 = por %p2426_p2, %p2425_p11 }
  0x5f   : > { %p2423_p10 = pneg %p2422_p8  ;;  %p2429_p7 = por %p2428_p6, %p2427_p3 }
  0x61   : > { %p2430_p9 = pnand %p2429_p7, %p2423_p10 }
  0x63   : > { %2433 = shalt.err (!%p2430_p9)
}
  0x64   : > { %s2434_s27 = scalar_lea.vmem %s2738_s18, %s2725_s11  ;;  %s2558_s20 = smov [#allocation2]  }
  0x65   : > { %p2435_p12 = scmp.ne.s32.totalorder %s2738_s18, %s2434_s27  ;;  %s2438_s22 = sshll.u32 %s2558_s20, 4  ;;  %s2439_s22 = int_to_ptr.vmem [resolvable:$false] %s2438_s22 }
  0x66   : > { %s2440_s14 = scalar_lea.vmem %s2439_s22, 7168  ;;  %p2441_p4 = scmp.lt.s32.totalorder %s2738_s18, %s2439_s22 }
  0x67   : > { %p2436_p0 = pnand %p2435_p12, %p1852_p13  ;;  %p2442_p5 = scmp.lt.s32.totalorder %s2440_s14, %s2434_s27 }
  0x69   : > { %p2437_p1 = pneg %p2436_p0  ;;  %p2443_p8 = por %p2442_p5, %p2441_p4 }
  0x6b   : > { %p2444_p11 = pnand %p2443_p8, %p2437_p1 }
  0x6d   : > { %2447 = shalt.err (!%p2444_p11)
}
  0x6e   : > { %s2559_s19 = smov 896   ;;  %s2560_s10 = smov 56  }
  0x6f   : > { %305 = dma.hbm_to_vmem [thread:$0]  (%p1852_p13), %s2736_s13, %s2725_s11, %s2738_s18, %s2728_s12, %s2559_s19, %s2559_s19, %s2560_s10  }
  0x70 PF: > { %p2967_p10 = scmp.ne.s32.totalorder %s2964_s17, 0 }
  0x71   : > { %s2768_s21 = sand.u32 (!%p2967_p10), 1, %s2510_s28   ;;  %p2968_p2 = scmp.ne.s32.totalorder (!%p2967_p10), %s2962_s15, 0 }
  0x72   : > { %311 = sbr.rel (%p2967_p10) target bundleno = 1092 (0x444), region = 52  ;;  %s314_s24 = scalar_lea.sflag (!%p2967_p10), [#allocation3], %s2768_s21 }
  0x73   : > { %s2059_s23 = smul.u32 (!%p2967_p10), 224, %s2768_s21 }
  0x75   : > { %s2772_s30 = scalar_lea.vmem (!%p2967_p10), [#allocation2], %s2059_s23 }
  0x79   : > { %2497 = dma.done.wait (%p2968_p2), %s314_s24, 3584  }
  0x7a   : > { %2499 = vsyncadd (%p2968_p2), %s314_s24, 4294963712  ;;  %p2969_p13 = scmp.eq.s32.totalorder %s2626_s9, 0 }
  0x7c   : > { %2501 = dma.done.wait (%p2969_p13), [#allocation5], 14592   ;;  %p2970_p3 = pmov %p2969_p13 }
  0x7d   : > { %v2185_v0 = vld [vmem:[#allocation4 + $0x104] ss:$8 sps:$4 sm:$0xff]   ;;  %v2187_v1 = vld [vmem:[#allocation4 + $0x100] ss:$8 sps:$4 sm:$0xff]   ;;  %v2188_v2 = vld [vmem:[#allocation4 + $0x114] ss:$8 sps:$4 sm:$0xff]  }
  0x7e   : > { %2503 = vsyncadd (%p2970_p3), [#allocation5], 4294952704  ;;  %1071 = vmatprep.subr.bf16.mxu0 %v2185_v0  ;;  %v2190_v3 = vld [vmem:[#allocation4 + $0x110] ss:$8 sps:$4 sm:$0xff]   ;;  %v2191_v4 = vld [vmem:[#allocation4 + $0x124] ss:$8 sps:$4 sm:$0xff]  }
  0x7f   : > { %1072 = vmatpush1.bf16.msra.mxu0 %v2187_v1  ;;  %v2193_v5 = vld [vmem:[#allocation4 + $0x120] ss:$8 sps:$4 sm:$0xff]   ;;  %v2194_v6 = vld [vmem:[#allocation4 + $0x134] ss:$8 sps:$4 sm:$0xff]   ;;  %v2196_v7 = vld [vmem:[#allocation4 + $0x130] ss:$8 sps:$4 sm:$0xff]  }
  0x80   : > { %1073 = vmatprep.subr.bf16.mxu0 %v2188_v2  ;;  %v2197_v8 = vld [vmem:[#allocation4 + $0x144] ss:$8 sps:$4 sm:$0xff]   ;;  %v2199_v9 = vld [vmem:[#allocation4 + $0x140] ss:$8 sps:$4 sm:$0xff]   ;;  %v2200_v10 = vld [vmem:[#allocation4 + $0x154] ss:$8 sps:$4 sm:$0xff]  }
  0x81   : > { %v2221_v11 = vld [vmem:[#allocation4 + $0x4] ss:$8 sps:$4 sm:$0xff]   ;;  %v2223_v12 = vld [vmem:[#allocation4] ss:$8 sps:$4 sm:$0xff]   ;;  %v2202_v13 = vld [vmem:[#allocation4 + $0x150] ss:$8 sps:$4 sm:$0xff]  }
  0x82   : > { %1018 = vmatprep.subr.bf16.mxu1 %v2221_v11  ;;  %v2227_v14 = vld [vmem:[#allocation4 + $0x14] ss:$8 sps:$4 sm:$0xff]   ;;  %v2229_v15 = vld [vmem:[#allocation4 + $0x10] ss:$8 sps:$4 sm:$0xff]   ;;  %v2203_v16 = vld [vmem:[#allocation4 + $0x164] ss:$8 sps:$4 sm:$0xff]  }
  0x83   : > { %1074 = vmatpush1.bf16.msra.mxu0 %v2190_v3  ;;  %1019 = vmatpush1.bf16.msra.mxu1 %v2223_v12  ;;  %v2205_v17 = vld [vmem:[#allocation4 + $0x160] ss:$8 sps:$4 sm:$0xff]   ;;  %v2233_v18 = vld [vmem:[#allocation4 + $0x24] ss:$8 sps:$4 sm:$0xff]   ;;  %v2206_v19 = vld [vmem:[#allocation4 + $0x174] ss:$8 sps:$4 sm:$0xff]  }
  0x84   : > { %1075 = vmatprep.subr.bf16.mxu0 %v2191_v4  ;;  %1020 = vmatprep.subr.bf16.mxu1 %v2227_v14  ;;  %v2235_v20 = vld [vmem:[#allocation4 + $0x20] ss:$8 sps:$4 sm:$0xff]   ;;  %v2239_v21 = vld [vmem:[#allocation4 + $0x34] ss:$8 sps:$4 sm:$0xff]   ;;  %v2208_v22 = vld [vmem:[#allocation4 + $0x170] ss:$8 sps:$4 sm:$0xff]  }
  0x85   : > { %v2209_v23 = vld [vmem:[#allocation4 + $0x184] ss:$8 sps:$4 sm:$0xff]   ;;  %v2241_v24 = vld [vmem:[#allocation4 + $0x30] ss:$8 sps:$4 sm:$0xff]   ;;  %v2211_v29 = vld [vmem:[#allocation4 + $0x180] ss:$8 sps:$4 sm:$0xff]  }
  0x86   : > { %v2245_v25 = vld [vmem:[#allocation4 + $0x44] ss:$8 sps:$4 sm:$0xff]   ;;  %v372_v26 = vld [vmem:[%s2772_s30 + $0x18] sm:$0xff]  ;;  %v379_v27 = vld [vmem:[%s2772_s30 + $0x50] sm:$0xff]  ;;  %vm1011_vm0 = vcmask 130048   ;;  %s1859_s22 = sshll.u32 %s2768_s21, 5 }
  0x87   : > { %1076 = vmatpush1.bf16.msra.mxu0 %v2193_v5  ;;  %1021 = vmatpush1.bf16.msra.mxu1 %v2229_v15  ;;  %v400_v28 = vpack.c.bf16 %v379_v27, %v372_v26  ;;  %v2212_v30 = vld [vmem:[#allocation4 + $0x194] ss:$8 sps:$4 sm:$0xff]   ;;  %v2247_v31 = vld [vmem:[#allocation4 + $0x40] ss:$8 sps:$4 sm:$0xff]   ;;  %v2214_v33 = vld [vmem:[#allocation4 + $0x190] ss:$8 sps:$4 sm:$0xff]  }
  0x88   : > { %1077 = vmatprep.subr.bf16.mxu0 %v2194_v6  ;;  %1022 = vmatprep.subr.bf16.mxu1 %v2233_v18  ;;  %v2251_v32 = vld [vmem:[#allocation4 + $0x54] ss:$8 sps:$4 sm:$0xff]   ;;  %v2215_v34 = vld [vmem:[#allocation4 + $0x1a4] ss:$8 sps:$4 sm:$0xff]   ;;  %v2253_v35 = vld [vmem:[#allocation4 + $0x50] ss:$8 sps:$4 sm:$0xff]  }
  0x89   : > { %1103 = vmatprep.mubr.bf16.mxu0 %v400_v28  ;;  %v2257_v36 = vld [vmem:[#allocation4 + $0x64] ss:$8 sps:$4 sm:$0xff]   ;;  %v2217_v37 = vld [vmem:[#allocation4 + $0x1a0] ss:$8 sps:$4 sm:$0xff]   ;;  %v2218_v38 = vld [vmem:[#allocation4 + $0x1b4] ss:$8 sps:$4 sm:$0xff]  }
  0x8a   : > { %v2259_v39 = vld [vmem:[#allocation4 + $0x60] ss:$8 sps:$4 sm:$0xff]   ;;  %v2263_v40 = vld [vmem:[#allocation4 + $0x74] ss:$8 sps:$4 sm:$0xff]   ;;  %v2220_v41 = vld [vmem:[#allocation4 + $0x1b0] ss:$8 sps:$4 sm:$0xff]  }
  0x8b   : > { %1078 = vmatpush1.bf16.msra.mxu0 %v2196_v7  ;;  %1023 = vmatpush1.bf16.msra.mxu1 %v2235_v20  ;;  %v2224_v42 = vld [vmem:[#allocation4 + $0x1c4] ss:$8 sps:$4 sm:$0xff]   ;;  %v2265_v43 = vld [vmem:[#allocation4 + $0x70] ss:$8 sps:$4 sm:$0xff]   ;;  %v2226_v45 = vld [vmem:[#allocation4 + $0x1c0] ss:$8 sps:$4 sm:$0xff]  }
  0x8c   : > { %1079 = vmatprep.subr.bf16.mxu0 %v2197_v8  ;;  %1024 = vmatprep.subr.bf16.mxu1 %v2239_v21  ;;  %v2269_v44 = vld [vmem:[#allocation4 + $0x84] ss:$8 sps:$4 sm:$0xff]   ;;  %v2230_v46 = vld [vmem:[#allocation4 + $0x1d4] ss:$8 sps:$4 sm:$0xff]   ;;  %v2271_v47 = vld [vmem:[#allocation4 + $0x80] ss:$8 sps:$4 sm:$0xff]  }
  0x8d   : > { %v2275_v48 = vld [vmem:[#allocation4 + $0x94] ss:$8 sps:$4 sm:$0xff]   ;;  %v2232_v49 = vld [vmem:[#allocation4 + $0x1d0] ss:$8 sps:$4 sm:$0xff]   ;;  %v2236_v50 = vld [vmem:[#allocation4 + $0x1e4] ss:$8 sps:$4 sm:$0xff]  }
  0x8e   : > { %v2277_v51 = vld [vmem:[#allocation4 + $0x90] ss:$8 sps:$4 sm:$0xff]   ;;  %v2281_v52 = vld [vmem:[#allocation4 + $0xa4] ss:$8 sps:$4 sm:$0xff]   ;;  %v2238_v53 = vld [vmem:[#allocation4 + $0x1e0] ss:$8 sps:$4 sm:$0xff]  }
  0x8f   : > { %1080 = vmatpush1.bf16.msra.mxu0 %v2199_v9  ;;  %1025 = vmatpush1.bf16.msra.mxu1 %v2241_v24  ;;  %v2242_v54 = vld [vmem:[#allocation4 + $0x1f4] ss:$8 sps:$4 sm:$0xff]   ;;  %v2283_v55 = vld [vmem:[#allocation4 + $0xa0] ss:$8 sps:$4 sm:$0xff]   ;;  %v2244_v57 = vld [vmem:[#allocation4 + $0x1f0] ss:$8 sps:$4 sm:$0xff]  }
  0x90   : > { %1081 = vmatprep.subr.bf16.mxu0 %v2200_v10  ;;  %1026 = vmatprep.subr.bf16.mxu1 %v2245_v25  ;;  %v2287_v56 = vld [vmem:[#allocation4 + $0xb4] ss:$8 sps:$4 sm:$0xff]   ;;  %v2250_v58 = vld [vmem:[#allocation4 + $0x204] ss:$8 sps:$4 sm:$0xff]   ;;  %v2289_v61 = vld [vmem:[#allocation4 + $0xb0] ss:$8 sps:$4 sm:$0xff]  }
  0x91   : > { %v371_v59 = vld [vmem:[%s2772_s30 + $0x10] sm:$0xff]  ;;  %v378_v60 = vld [vmem:[%s2772_s30 + $0x48] sm:$0xff]  ;;  %v377_v0 = vld [vmem:[%s2772_s30 + $0x40] sm:$0xff]  ;;  %vm1582_vm9 = vcmask 80896   ;;  %s2880_s14 = scalar_lea.vmem [#allocation7], %s1859_s22   ;;  %p2971_p6 = scmp.ne.s32.totalorder %s2963_s16, 0 }
  0x92   : > { %v2293_v62 = vld [vmem:[#allocation4 + $0xc4] ss:$8 sps:$4 sm:$0xff]   ;;  %v2248_v2 = vld [vmem:[#allocation4 + $0x200] ss:$8 sps:$4 sm:$0xff]   ;;  %v399_v3 = vpack.c.bf16 %v378_v60, %v371_v59  ;;  %v2256_v4 = vld [vmem:[#allocation4 + $0x214] ss:$8 sps:$4 sm:$0xff]  }
  0x93   : > { %1082 = vmatpush1.bf16.msra.mxu0 %v2202_v13  ;;  %1027 = vmatpush1.bf16.msra.mxu1 %v2247_v31  ;;  %v370_v63 = vld [vmem:[%s2772_s30 + $0x8] sm:$0xff]  ;;  %v2299_v6 = vld [vmem:[#allocation4 + $0xd4] ss:$8 sps:$4 sm:$0xff]   ;;  %v2254_v7 = vld [vmem:[#allocation4 + $0x210] ss:$8 sps:$4 sm:$0xff]   ;;  %s1978_s19 = sshll.u32 (%p2971_p6), %s2626_s9, 2 }
  0x94   : > { %1083 = vmatprep.subr.bf16.mxu0 %v2203_v16  ;;  %1028 = vmatprep.subr.bf16.mxu1 %v2251_v32  ;;  %v398_v1 = vpack.c.bf16 %v377_v0, %v370_v63  ;;  %v2295_v5 = vld [vmem:[#allocation4 + $0xc0] ss:$8 sps:$4 sm:$0xff]   ;;  %v2262_v8 = vld [vmem:[#allocation4 + $0x224] ss:$8 sps:$4 sm:$0xff]   ;;  %v2301_v9 = vld [vmem:[#allocation4 + $0xd0] ss:$8 sps:$4 sm:$0xff]  }
  0x95   : > { %v386_v10 = vld [vmem:[%s2772_s30 + $0x88] sm:$0xff]  ;;  %v393_v11 = vld [vmem:[%s2772_s30 + $0xc0] sm:$0xff]  ;;  %v392_v13 = vld [vmem:[%s2772_s30 + $0xb8] sm:$0xff]  ;;  %s1994_s10 = sshll.u32 (%p2971_p6), %s2626_s9, 5  ;;  %s1595_s21 = ssub.s32 (%p2971_p6), 9, %s1978_s19 }
  0x96   : > { %1050 = vmatprep.mubr.bf16.mxu1 %v398_v1  ;;  %v385_v12 = vld [vmem:[%s2772_s30 + $0x80] sm:$0xff]  ;;  %v407_v15 = vpack.c.bf16 %v393_v11, %v386_v10  ;;  %v2268_v21 = vld [vmem:[#allocation4 + $0x234] ss:$8 sps:$4 sm:$0xff]   ;;  %v2313_v24 = vld [vmem:[#allocation4 + $0xf0] ss:$8 sps:$4 sm:$0xff]   ;;  %p1596_p7 = scmp.lt.s32.totalorder (%p2971_p6), %s1595_s21, 4 }
  0x97   : > { %1084 = vmatpush1.bf16.msra.mxu0 %v2205_v17  ;;  %1029 = vmatpush1.bf16.msra.mxu1 %v2253_v35  ;;  %v2305_v14 = vld [vmem:[#allocation4 + $0xe4] ss:$8 sps:$4 sm:$0xff]   ;;  %v406_v16 = vpack.c.bf16 %v392_v13, %v385_v12  ;;  %v2260_v18 = vld [vmem:[#allocation4 + $0x220] ss:$8 sps:$4 sm:$0xff]   ;;  %v376_v28 = vld [vmem:[%s2772_s30 + $0x38] sm:$0xff] }
  0x98   : > { %1085 = vmatprep.subr.bf16.mxu0 %v2206_v19  ;;  %1030 = vmatprep.subr.bf16.mxu1 %v2257_v36  ;;  %v374_v17 = vld [vmem:[%s2772_s30 + $0x28] sm:$0xff]  ;;  %v381_v20 = vld [vmem:[%s2772_s30 + $0x60] sm:$0xff]  ;;  %v391_v31 = vld [vmem:[%s2772_s30 + $0xb0] sm:$0xff] }
  0x99   : > { %v2307_v19 = vld [vmem:[#allocation4 + $0xe0] ss:$8 sps:$4 sm:$0xff]   ;;  %v402_v25 = vpack.c.bf16 %v381_v20, %v374_v17  ;;  %v2274_v26 = vld [vmem:[#allocation4 + $0x244] ss:$8 sps:$4 sm:$0xff]   ;;  %v2314_v59 = vld [vmem:[#allocation4 + $0x2b0] ss:$8 sps:$4 sm:$0xff]  }
  0x9a   : > { %v369_v27 = vld [vmem:[%s2772_s30] sm:$0xff]  ;;  %v2323_v63 = vld [vmem:[#allocation4 + $0x2d0] ss:$8 sps:$4 sm:$0xff]   ;;  %v394_v11 = vld [vmem:[%s2772_s30 + $0xc8] sm:$0xff] }
  0x9b   : > { %1086 = vmatpush1.bf16.msra.mxu0 %v2208_v22  ;;  %1031 = vmatpush1.bf16.msra.mxu1 %v2259_v39  ;;  %v2311_v22 = vld [vmem:[#allocation4 + $0xf4] ss:$8 sps:$4 sm:$0xff]   ;;  %v2272_v32 = vld [vmem:[#allocation4 + $0x240] ss:$8 sps:$4 sm:$0xff]   ;;  %v397_v35 = vpack.c.bf16 %v376_v28, %v369_v27  ;;  %v2319_v60 = vld [vmem:[#allocation4 + $0x2c4] ss:$8 sps:$4 sm:$0xff]  }
  0x9c   : > { %1087 = vmatprep.subr.bf16.mxu0 %v2209_v23  ;;  %1032 = vmatprep.subr.bf16.mxu1 %v2263_v40  ;;  %v2266_v23 = vld [vmem:[#allocation4 + $0x230] ss:$8 sps:$4 sm:$0xff]   ;;  %v390_v39 = vld [vmem:[%s2772_s30 + $0xa8] sm:$0xff] }
  0x9d   : > { %v2286_v40 = vld [vmem:[#allocation4 + $0x264] ss:$8 sps:$4 sm:$0xff]   ;;  %v2326_v1 = vld [vmem:[#allocation4 + $0x2e0] ss:$8 sps:$4 sm:$0xff]   ;;  %v387_v10 = vld [vmem:[%s2772_s30 + $0x90] sm:$0xff] }
  0x9e   : > { %v2328_v0 = vld [vmem:[#allocation4 + $0x2e4] ss:$8 sps:$4 sm:$0xff]   ;;  %v408_v12 = vpack.c.bf16 %v394_v11, %v387_v10 }
  0x9f   : > { %1088 = vmatpush1.bf16.msra.mxu0 %v2211_v29  ;;  %1033 = vmatpush1.bf16.msra.mxu1 %v2265_v43  ;;  %v2322_v29 = vld [vmem:[#allocation4 + $0x304] ss:$8 sps:$4 sm:$0xff]   ;;  %v2292_v43 = vld [vmem:[#allocation4 + $0x274] ss:$8 sps:$4 sm:$0xff]  }
  0xa0   : > { %1089 = vmatprep.subr.bf16.mxu0 %v2212_v30  ;;  %1034 = vmatprep.subr.bf16.mxu1 %v2269_v44  ;;  %v384_v30 = vld [vmem:[%s2772_s30 + $0x78] sm:$0xff] }
  0xa1   : > { %v405_v36 = vpack.c.bf16 %v391_v31, %v384_v30  ;;  %v2290_v44 = vld [vmem:[#allocation4 + $0x270] ss:$8 sps:$4 sm:$0xff]  }
  0xa3   : > { %1090 = vmatpush1.bf16.msra.mxu0 %v2214_v33  ;;  %1035 = vmatpush1.bf16.msra.mxu1 %v2271_v47  ;;  %v2320_v33 = vld [vmem:[#allocation4 + $0x300] ss:$8 sps:$4 sm:$0xff]  }
  0xa4   : > { %1091 = vmatprep.subr.bf16.mxu0 %v2215_v34  ;;  %1036 = vmatprep.subr.bf16.mxu1 %v2275_v48  ;;  %v2280_v34 = vld [vmem:[#allocation4 + $0x254] ss:$8 sps:$4 sm:$0xff]   ;;  %v382_v47 = vld [vmem:[%s2772_s30 + $0x68] sm:$0xff] }
  0xa5   : > { %v2298_v48 = vld [vmem:[#allocation4 + $0x284] ss:$8 sps:$4 sm:$0xff]  }
  0xa7   : > { %1092 = vmatpush1.bf16.msra.mxu0 %v2217_v37  ;;  %1037 = vmatpush1.bf16.msra.mxu1 %v2277_v51  ;;  %v2278_v37 = vld [vmem:[#allocation4 + $0x250] ss:$8 sps:$4 sm:$0xff]   ;;  %v2304_v51 = vld [vmem:[#allocation4 + $0x294] ss:$8 sps:$4 sm:$0xff]  }
  0xa8   : > { %1093 = vmatprep.subr.bf16.mxu0 %v2218_v38  ;;  %1038 = vmatprep.subr.bf16.mxu1 %v2281_v52  ;;  %v383_v38 = vld [vmem:[%s2772_s30 + $0x70] sm:$0xff] }
  0xa9   : > { %v2302_v52 = vld [vmem:[#allocation4 + $0x290] ss:$8 sps:$4 sm:$0xff]  }
  0xab   : > { %1094 = vmatpush1.bf16.msra.mxu0 %v2220_v41  ;;  %1039 = vmatpush1.bf16.msra.mxu1 %v2283_v55  ;;  %v404_v41 = vpack.c.bf16 %v390_v39, %v383_v38  ;;  %v2310_v55 = vld [vmem:[#allocation4 + $0x2a4] ss:$8 sps:$4 sm:$0xff]  }
  0xac   : > { %1095 = vmatprep.subr.bf16.mxu0 %v2224_v42  ;;  %1040 = vmatprep.subr.bf16.mxu1 %v2287_v56  ;;  %v2284_v42 = vld [vmem:[#allocation4 + $0x260] ss:$8 sps:$4 sm:$0xff]  }
  0xaf   : > { %1096 = vmatpush1.bf16.msra.mxu0 %v2226_v45  ;;  %1041 = vmatpush1.bf16.msra.mxu1 %v2289_v61  ;;  %v2561_v45 = vmov 0   ;;  %v2317_v61 = vld [vmem:[#allocation4 + $0x2c0] ss:$8 sps:$4 sm:$0xff]  }
  0xb0   : > { %1097 = vmatprep.subr.bf16.mxu0 %v2230_v46  ;;  %1042 = vmatprep.subr.bf16.mxu1 %v2293_v62  ;;  %v375_v46 = vld [vmem:[%s2772_s30 + $0x30] sm:$0xff] }
  0xb1   : > { %v2325_v62 = vld [vmem:[#allocation4 + $0x2d4] ss:$8 sps:$4 sm:$0xff]  }
  0xb3   : > { %1098 = vmatpush1.bf16.msra.mxu0 %v2232_v49  ;;  %1043 = vmatpush1.bf16.msra.mxu1 %v2295_v5  ;;  %v403_v49 = vpack.c.bf16 %v382_v47, %v375_v46  ;;  %v380_v5 = vld [vmem:[%s2772_s30 + $0x58] sm:$0xff] }
  0xb4   : > { %1099 = vmatprep.subr.bf16.mxu0 %v2236_v50  ;;  %1044 = vmatprep.subr.bf16.mxu1 %v2299_v6  ;;  %v2296_v50 = vld [vmem:[#allocation4 + $0x280] ss:$8 sps:$4 sm:$0xff]   ;;  %v388_v6 = vld [vmem:[%s2772_s30 + $0x98] sm:$0xff] }
  0xb7   : > { %1100 = vmatpush1.bf16.msra.mxu0 %v2238_v53  ;;  %1045 = vmatpush1.bf16.msra.mxu1 %v2301_v9  ;;  %v389_v53 = vld [vmem:[%s2772_s30 + $0xa0] sm:$0xff] }
  0xb8   : > { %1101 = vmatprep.subr.bf16.mxu0 %v2242_v54  ;;  %1046 = vmatprep.subr.bf16.mxu1 %v2305_v14  ;;  %v396_v54 = vld [vmem:[%s2772_s30 + $0xd8] sm:$0xff] }
  0xb9   : > { %v410_v56 = vpack.c.bf16 %v396_v54, %v389_v53 }
  0xbb   : > { %1102 = vmatpush1.bf16.msra.mxu0 %v2244_v57  ;;  %1047 = vmatpush1.bf16.msra.mxu1 %v2307_v19  ;;  %v2308_v57 = vld [vmem:[#allocation4 + $0x2a0] ss:$8 sps:$4 sm:$0xff]  }
  0xbc   : > { %1124 = vmatprep.subr.bf16.mxu0 %v2250_v58  ;;  %1048 = vmatprep.subr.bf16.mxu1 %v2311_v22  ;;  %v2316_v58 = vld [vmem:[#allocation4 + $0x2b4] ss:$8 sps:$4 sm:$0xff]  }
  0xbe   : > { %1104 = vmatmul.mubr.bf16.vlgmr.msra.gmra.mrb[0].mxu0 %v399_v3  ;;  %v2329_v3 = vld [vmem:[#allocation4 + $0x2f0] ss:$8 sps:$4 sm:$0xff]  }
  0xbf   : > { %1125 = vmatpush1.bf16.msra.mxu0 %v2248_v2  ;;  %1113 = vmatprep.mubr.bf16.mxu0 %v407_v15  ;;  %v2331_v2 = vld [vmem:[#allocation4 + $0x2f4] ss:$8 sps:$4 sm:$0xff]  }
  0xc0   : > { %1126 = vmatprep.subr.bf16.mxu0 %v2256_v4  ;;  %1049 = vmatpush1.bf16.msra.mxu1 %v2313_v24  ;;  %v373_v4 = vld [vmem:[%s2772_s30 + $0x20] sm:$0xff] }
  0xc1   : > { %1177 = vmatprep.subr.bf16.mxu1 %v2322_v29  ;;  %v511_v29 = vlaneseq }
  0xc3   : > { %1127 = vmatpush1.bf16.msra.mxu0 %v2254_v7  ;;  %1051 = vmatmul.mubr.bf16.vlgmr.msra.gmra.mrb[0].mxu1 %v397_v35  ;;  %v395_v7 = vld [vmem:[%s2772_s30 + $0xd0] sm:$0xff]  ;;  %v512_v30 = vshrl.u32 %v511_v29, 7  ;;  %s2893_s30 = scalar_lea.vmem (%p2971_p6), %s2953_s8, %s1994_s10  }
  0xc4   : > { %1128 = vmatprep.subr.bf16.mxu0 %v2262_v8  ;;  %1178 = vmatpush1.bf16.msra.mxu1 %v2320_v33  ;;  %v401_v8 = vpack.c.bf16 %v380_v5, %v373_v4  ;;  %v409_v9 = vpack.c.bf16 %v395_v7, %v388_v6 }
  0xc5   : > { %1060 = vmatprep.mubr.bf16.mxu1 %v405_v36  ;;  %v2812_v31 = vsub.s32 0, %v512_v30  ;;  %v2817_v33 = vsub.s32 1, %v512_v30 }
  0xc6   : > { %1114 = vmatmul.mubr.bf16.gmra.mrb[4].mxu0 %v406_v16 }
  0xc7   : > { %1129 = vmatpush1.bf16.msra.mxu0 %v2260_v18  ;;  %1156 = vmatprep.mubr.bf16.mxu0 %v402_v25 }
  0xc8   : > { %1130 = vmatprep.subr.bf16.mxu0 %v2268_v21 }
  0xcb   : > { %1131 = vmatpush1.bf16.msra.mxu0 %v2266_v23  ;;  %1061 = vmatmul.mubr.bf16.gmra.mrb[4].mxu1 %v404_v41 }
  0xcc   : > { %1132 = vmatprep.subr.bf16.mxu0 %v2274_v26  ;;  %1209 = vmatprep.mubr.bf16.mxu1 %v2561_v45 }
  0xcf   : > { %1133 = vmatpush1.bf16.msra.mxu0 %v2272_v32  ;;  %v509_v32 = vld [vmem:[%s2947_s2] sm:$0x3] }
  0xd0   : > { %1134 = vmatprep.subr.bf16.mxu0 %v2280_v34  ;;  %v514_v34 = vrot.slane %v509_v32, %v2812_v31  ;;  %v518_v35 = vrot.slane %v509_v32, %v2817_v33 }
  0xd3   : > { %1135 = vmatpush1.bf16.msra.mxu0 %v2278_v37  ;;  %1958 = vmatmul.mubr.msk.bf16.vlgmr.msra.gmra.mrb[8].mxu1 %vm1011_vm0, %v403_v49 }
  0xd4   : > { %1136 = vmatprep.subr.bf16.mxu0 %v2286_v40  ;;  %1219 = vmatprep.mubr.bf16.mxu1 %v2561_v45 }
  0xd7   : > { %1137 = vmatpush1.bf16.msra.mxu0 %v2284_v42 }
  0xd8   : > { %1138 = vmatprep.subr.bf16.mxu0 %v2292_v43 }
  0xdb   : > { %1139 = vmatpush1.bf16.msra.mxu0 %v2290_v44  ;;  %1959 = vmatmul.mubr.msk.bf16.gmra.mrb[12].mxu1 %vm1011_vm0, %v410_v56 }
  0xdc   : > { %1140 = vmatprep.subr.bf16.mxu0 %v2298_v48 }
  0xdf   : > { %1141 = vmatpush1.bf16.msra.mxu0 %v2296_v50 }
  0xe0   : > { %1142 = vmatprep.subr.bf16.mxu0 %v2304_v51 }
  0xe3   : > { %1143 = vmatpush1.bf16.msra.mxu0 %v2302_v52 }
  0xe4   : > { %1144 = vmatprep.subr.bf16.mxu0 %v2310_v55 }
  0xe7   : > { %1145 = vmatpush1.bf16.msra.mxu0 %v2308_v57 }
  0xe8   : > { %1146 = vmatprep.subr.bf16.mxu0 %v2316_v58 }
  0xeb   : > { %1147 = vmatpush1.bf16.msra.mxu0 %v2314_v59 }
  0xec   : > { %1148 = vmatprep.subr.bf16.mxu0 %v2319_v60 }
  0xef   : > { %1149 = vmatpush1.bf16.msra.mxu0 %v2317_v61 }
  0xf0   : > { %1150 = vmatprep.subr.bf16.mxu0 %v2325_v62 }
  0xf3   : > { %1151 = vmatpush1.bf16.msra.mxu0 %v2323_v63 }
  0xf4   : > { %1152 = vmatprep.subr.bf16.mxu0 %v2328_v0 }
  0xf7   : > { %1153 = vmatpush1.bf16.msra.mxu0 %v2326_v1 }
  0xf8   : > { %1154 = vmatprep.subr.bf16.mxu0 %v2331_v2 }
  0xfb   : > { %1155 = vmatpush1.bf16.msra.mxu0 %v2329_v3 }
  0xfe   : > { %1157 = vmatmul.mubr.bf16.vlgmr.msra.gmra.mrb[0].mxu0 %v401_v8 }
  0xff   : > { %1166 = vmatprep.mubr.bf16.mxu0 %v409_v9 }
 0x106   : > { %1167 = vmatmul.mubr.bf16.gmra.mrb[4].mxu0 %v408_v12 }
 0x196   : > { %v1052_v13 = vpop.f32.mrb[0].mxu1 }
 0x197   : > { %v1054_v14 = vpop.f32.mrb[1].mxu1  ;;  %v1053_v36 = vadd.f32 %v1052_v13, %v514_v34 }
 0x198   : > { %v1056_v15 = vpop.f32.mrb[2].mxu1  ;;  %v1055_v37 = vadd.f32 %v1054_v14, %v518_v35 }
 0x199   : > { %v1058_v16 = vpop.f32.mrb[3].mxu1  ;;  %v1057_v39 = vadd.f32 %v1056_v15, %v514_v34 }
 0x19a   : > { %v1059_v42 = vadd.f32 %v1058_v16, %v518_v35 }
 0x19e   : > { %v1062_v17 = vpop.f32.mrb[4].mxu1 }
 0x19f   : > { %v1064_v18 = vpop.f32.mrb[5].mxu1  ;;  %v1063_v54 = vadd.f32 %v1062_v17, %v514_v34 }
 0x1a0   : > { %v1066_v19 = vpop.f32.mrb[6].mxu1  ;;  %v1065_v57 = vadd.f32 %v1064_v18, %v518_v35 }
 0x1a1   : > { %v1068_v20 = vpop.f32.mrb[7].mxu1  ;;  %v1067_v61 = vadd.f32 %v1066_v19, %v514_v34 }
 0x1a2   : > { %v1069_v1 = vadd.f32 %v1068_v20, %v518_v35 }
 0x1a6   : > { %v1211_v21 = vpop.f32.mrb[8].mxu1 }
 0x1a7   : > { %v1213_v22 = vpop.f32.mrb[9].mxu1 }
 0x1a8   : > { %v1215_v23 = vpop.f32.mrb[10].mxu1 }
 0x1a9   : > { %v1217_v24 = vpop.f32.mrb[11].mxu1 }
 0x1ae   : > { %v1221_v25 = vpop.f32.mrb[12].mxu1 }
 0x1af   : > { %v1223_v26 = vpop.f32.mrb[13].mxu1 }
 0x1b0   : > { %v1225_v27 = vpop.f32.mrb[14].mxu1 }
 0x1b1   : > { %v1227_v28 = vpop.f32.mrb[15].mxu1 }
 0x1d1   : > { %v1158_v38 = vpop.f32.mrb[0].mxu0 }
 0x1d2   : > { %v2026_v40 = vadd.f32 %v1158_v38, %v1053_v36  ;;  %v1160_v41 = vpop.f32.mrb[1].mxu0 }
 0x1d3   : > { %v2029_v43 = vadd.f32 %v1160_v41, %v1055_v37  ;;  %v1162_v44 = vpop.f32.mrb[2].mxu0 }
 0x1d4   : > { %v2027_v45 = vadd.f32 %v2026_v40, %v1211_v21  ;;  %v2032_v46 = vadd.f32 %v1162_v44, %v1057_v39  ;;  %v1164_v47 = vpop.f32.mrb[3].mxu0 }
 0x1d5   : > { %v2030_v48 = vadd.f32 %v2029_v43, %v1213_v22  ;;  %v2035_v49 = vadd.f32 %v1164_v47, %v1059_v42 }
 0x1d6   : > { %v2033_v50 = vadd.f32 %v2032_v46, %v1215_v23  ;;  %vm1230_vm1 = vcmp.ge.f32.partialorder %v2027_v45, 0.0  ;;  %v1238_v51 = vmul.f32 0.02, %v2027_v45 }
 0x1d7   : > { %v2036_v52 = vadd.f32 %v2035_v49, %v1217_v24  ;;  %vm1231_vm2 = vcmp.ge.f32.partialorder %v2030_v48, 0.0  ;;  %v1239_v53 = vmul.f32 0.02, %v2030_v48  ;;  %v2332_v24 = vld [vmem:[#allocation6 + $0x40] sm:$0xff]  }
 0x1d8   : > { %v1246_v55 = vsel %vm1230_vm1, %v2027_v45, %v1238_v51  ;;  %vm1232_vm3 = vcmp.ge.f32.partialorder %v2033_v50, 0.0  ;;  %v1240_v56 = vmul.f32 0.02, %v2033_v50  ;;  %1997 = vmatprep.subr.bf16.mxu1 %v2332_v24 }
 0x1d9   : > { %v1168_v58 = vpop.f32.mrb[4].mxu0  ;;  %v1247_v59 = vsel %vm1231_vm2, %v2030_v48, %v1239_v53  ;;  %vm1233_vm4 = vcmp.ge.f32.partialorder %v2036_v52, 0.0  ;;  %v1241_v60 = vmul.f32 0.02, %v2036_v52 }
 0x1da   : > { %v2038_v62 = vadd.f32 %v1168_v58, %v1063_v54  ;;  %v1170_v63 = vpop.f32.mrb[5].mxu0  ;;  %v1254_v0 = vadd.f32 %v1247_v59, %v1246_v55  ;;  %v1248_v4 = vsel %vm1232_vm3, %v2033_v50, %v1240_v56 }
 0x1db   : > { %v2041_v2 = vadd.f32 %v1170_v63, %v1065_v57  ;;  %v1172_v3 = vpop.f32.mrb[6].mxu0  ;;  %v1249_v5 = vsel %vm1233_vm4, %v2036_v52, %v1241_v60 }
 0x1dc   : > { %v2039_v6 = vadd.f32 %v2038_v62, %v1221_v25  ;;  %v2044_v7 = vadd.f32 %v1172_v3, %v1067_v61  ;;  %v1174_v8 = vpop.f32.mrb[7].mxu0  ;;  %1255 = vadd.xlane.f32.xlu0 %v1254_v0  ;;  %v1257_v12 = vadd.f32 %v1249_v5, %v1248_v4  ;;  %v2333_v25 = vld [vmem:[#allocation6] sm:$0xff]   ;;  %v2334_v3 = vld [vmem:[#allocation6 + $0x48] sm:$0xff]  }
 0x1dd   : > { %v2042_v9 = vadd.f32 %v2041_v2, %v1223_v26  ;;  %v2047_v10 = vadd.f32 %v1174_v8, %v1069_v1  ;;  %1998 = vmatpush3.bf16.msra.mxu1 %v2333_v25  ;;  %v1278_v26 = vld [vmem:[%s2952_s7] sm:$0x3]  ;;  %v2339_v8 = vld [vmem:[#allocation6 + $0x18] sm:$0xff]  }
 0x1de   : > { %v2045_v11 = vadd.f32 %v2044_v7, %v1225_v27  ;;  %vm1234_vm5 = vcmp.ge.f32.partialorder %v2039_v6, 0.0  ;;  %v1242_v13 = vmul.f32 0.02, %v2039_v6  ;;  %v1287_v29 = vrot.slane %v1278_v26, %v2817_v33  ;;  %1999 = vmatprep.subr.bf16.mxu1 %v2334_v3  ;;  %v2338_v7 = vld [vmem:[#allocation6 + $0x58] sm:$0xff]  }
 0x1df   : > { %v2048_v14 = vadd.f32 %v2047_v10, %v1227_v28  ;;  %vm1235_vm6 = vcmp.ge.f32.partialorder %v2042_v9, 0.0  ;;  %v1243_v15 = vmul.f32 0.02, %v2042_v9  ;;  %v1283_v28 = vrot.slane %v1278_v26, %v2812_v31  ;;  %v2341_v10 = vld [vmem:[#allocation6 + $0x20] sm:$0xff]   ;;  %v1338_v26 = vld [vmem:[%s2950_s5] sm:$0x3] }
 0x1e0   : > { %1258 = vadd.xlane.f32.xlu0 %v1257_v12  ;;  %v1250_v16 = vsel %vm1234_vm5, %v2039_v6, %v1242_v13  ;;  %vm1236_vm7 = vcmp.ge.f32.partialorder %v2045_v11, 0.0  ;;  %v1244_v17 = vmul.f32 0.02, %v2045_v11  ;;  %v2337_v6 = vld [vmem:[#allocation6 + $0x10] sm:$0xff]   ;;  %v2343_v12 = vld [vmem:[#allocation6 + $0x28] sm:$0xff]  }
 0x1e1   : > { %v1251_v18 = vsel %vm1235_vm6, %v2042_v9, %v1243_v15  ;;  %vm1237_vm8 = vcmp.ge.f32.partialorder %v2048_v14, 0.0  ;;  %v1245_v19 = vmul.f32 0.02, %v2048_v14  ;;  %v2340_v9 = vld [vmem:[#allocation6 + $0x60] sm:$0xff]   ;;  %v2344_v13 = vld [vmem:[#allocation6 + $0x70] sm:$0xff]   ;;  %v2346_v15 = vld [vmem:[#allocation6 + $0x78] sm:$0xff]  }
 0x1e2   : > { %v1260_v20 = vadd.f32 %v1251_v18, %v1250_v16  ;;  %v1252_v21 = vsel %vm1236_vm7, %v2045_v11, %v1244_v17  ;;  %v2342_v11 = vld [vmem:[#allocation6 + $0x68] sm:$0xff]  }
 0x1e3   : > { %v1253_v22 = vsel %vm1237_vm8, %v2048_v14, %v1245_v19  ;;  %v2345_v14 = vld [vmem:[#allocation6 + $0x30] sm:$0xff]  }
 0x1e4   : > { %1261 = vadd.xlane.f32.xlu1 %v1260_v20  ;;  %v1263_v23 = vadd.f32 %v1253_v22, %v1252_v21 }
 0x1e8   : > { %1264 = vadd.xlane.f32.xlu1 %v1263_v23 }
 0x269   : > { %v1256_v27 = vpop.xlane.xlu0 %1255 }
 0x26a   : > { %v1266_v30 = vmul.f32 0.005, %v1256_v27 }
 0x26c   : > { %v1270_v32 = vsub.f32 %v1246_v55, %v1266_v30  ;;  %v1271_v34 = vsub.f32 %v1247_v59, %v1266_v30  ;;  %v1343_v30 = vrot.slane %v1338_v26, %v2812_v31 }
 0x26d   : > { %v1259_v35 = vpop.xlane.xlu0 %1258 }
 0x26e   : > { %v2826_v36 = vmul.f32 %v1283_v28, %v1270_v32  ;;  %v2828_v37 = vmul.f32 %v1287_v29, %v1271_v34  ;;  %v1267_v38 = vmul.f32 0.005, %v1259_v35  ;;  %v1347_v34 = vrot.slane %v1338_v26, %v2817_v33 }
 0x270   : > { %v1272_v39 = vsub.f32 %v1248_v4, %v1267_v38  ;;  %v1273_v40 = vsub.f32 %v1249_v5, %v1267_v38  ;;  %v1298_v41 = vmul.f32 %v2826_v36, %v2826_v36  ;;  %v1299_v42 = vmul.f32 %v2828_v37, %v2828_v37  ;;  %v2335_v4 = vld [vmem:[#allocation6 + $0x8] sm:$0xff]   ;;  %v2336_v5 = vld [vmem:[#allocation6 + $0x50] sm:$0xff]  }
 0x271   : > { %v1262_v43 = vpop.xlane.xlu1 %1261  ;;  %2000 = vmatpush3.bf16.msra.mxu1 %v2335_v4 }
 0x272   : > { %v2834_v44 = vmul.f32 %v1283_v28, %v1272_v39  ;;  %v2836_v45 = vmul.f32 %v1287_v29, %v1273_v40  ;;  %v1268_v46 = vmul.f32 0.005, %v1262_v43  ;;  %v1306_v47 = vadd.f32 %v1299_v42, %v1298_v41  ;;  %2001 = vmatprep.subr.bf16.mxu1 %v2336_v5  ;;  %v1358_v39 = vld [vmem:[%s2951_s6] sm:$0x3] }
 0x273   : > { %v1363_v43 = vrot.slane %v1358_v39, %v2812_v31 }
 0x274   : > { %v1274_v48 = vsub.f32 %v1250_v16, %v1268_v46  ;;  %v1275_v49 = vsub.f32 %v1251_v18, %v1268_v46  ;;  %1307 = vadd.xlane.f32.xlu0 %v1306_v47  ;;  %v1300_v50 = vmul.f32 %v2834_v44, %v2834_v44  ;;  %v1301_v51 = vmul.f32 %v2836_v45, %v2836_v45  ;;  %v2347_v16 = vld [vmem:[#allocation6 + $0x38] sm:$0xff]  }
 0x275   : > { %v1265_v52 = vpop.xlane.xlu1 %1264  ;;  %2002 = vmatpush3.bf16.msra.mxu1 %v2337_v6  ;;  %v1367_v46 = vrot.slane %v1358_v39, %v2817_v33 }
 0x276   : > { %v2842_v53 = vmul.f32 %v1283_v28, %v1274_v48  ;;  %v2844_v54 = vmul.f32 %v1287_v29, %v1275_v49  ;;  %v1269_v55 = vmul.f32 0.005, %v1265_v52  ;;  %v1309_v56 = vadd.f32 %v1301_v51, %v1300_v50  ;;  %2003 = vmatprep.subr.bf16.mxu1 %v2338_v7 }
 0x278   : > { %v1276_v57 = vsub.f32 %v1252_v21, %v1269_v55  ;;  %v1277_v58 = vsub.f32 %v1253_v22, %v1269_v55  ;;  %1310 = vadd.xlane.f32.xlu1 %v1309_v56  ;;  %v1302_v59 = vmul.f32 %v2842_v53, %v2842_v53  ;;  %v1303_v60 = vmul.f32 %v2844_v54, %v2844_v54 }
 0x279   : > { %2004 = vmatpush3.bf16.msra.mxu1 %v2339_v8 }
 0x27a   : > { %v2850_v61 = vmul.f32 %v1283_v28, %v1276_v57  ;;  %v2852_v62 = vmul.f32 %v1287_v29, %v1277_v58  ;;  %v1312_v63 = vadd.f32 %v1303_v60, %v1302_v59  ;;  %2005 = vmatprep.subr.bf16.mxu1 %v2340_v9 }
 0x27c   : > { %1313 = vadd.xlane.f32.xlu0 %v1312_v63  ;;  %v1304_v0 = vmul.f32 %v2850_v61, %v2850_v61  ;;  %v1305_v1 = vmul.f32 %v2852_v62, %v2852_v62 }
 0x27d   : > { %2006 = vmatpush3.bf16.msra.mxu1 %v2341_v10 }
 0x27e   : > { %v1315_v2 = vadd.f32 %v1305_v1, %v1304_v0  ;;  %2007 = vmatprep.subr.bf16.mxu1 %v2342_v11 }
 0x280   : > { %1316 = vadd.xlane.f32.xlu1 %v1315_v2 }
 0x281   : > { %2008 = vmatpush3.bf16.msra.mxu1 %v2343_v12 }
 0x282   : > { %2009 = vmatprep.subr.bf16.mxu1 %v2344_v13 }
 0x285   : > { %2010 = vmatpush3.bf16.msra.mxu1 %v2345_v14 }
 0x286   : > { %2011 = vmatprep.subr.bf16.mxu1 %v2346_v15 }
 0x289   : > { %2012 = vmatpush3.bf16.msra.mxu1 %v2347_v16 }
 0x301   : > { %v1308_v17 = vpop.xlane.xlu0 %1307 }
 0x302   : > { %v1318_v18 = vmul.f32 0.005, %v1308_v17 }
 0x304   : > { %v1322_v19 = vadd.f32 1e-05, %v1318_v18 }
 0x305   : > { %v1311_v20 = vpop.xlane.xlu1 %1310 }
 0x306   : > { %2348 = vrsqrt.f32 %v1322_v19  ;;  %v1319_v21 = vmul.f32 0.005, %v1311_v20 }
 0x308   : > { %v1323_v22 = vadd.f32 1e-05, %v1319_v21 }
 0x309   : > { %v1314_v23 = vpop.xlane.xlu0 %1313 }
 0x30a   : > { %2350 = vrsqrt.f32 %v1323_v22  ;;  %v1320_v24 = vmul.f32 0.005, %v1314_v23 }
 0x30c   : > { %v1324_v25 = vadd.f32 1e-05, %v1320_v24 }
 0x30d   : > { %v1317_v27 = vpop.xlane.xlu1 %1316 }
 0x30e   : > { %2352 = vrsqrt.f32 %v1324_v25  ;;  %v1321_v28 = vmul.f32 0.005, %v1317_v27 }
 0x310   : > { %v2349_v29 = vpop.eup %2348  ;;  %v1325_v32 = vadd.f32 1e-05, %v1321_v28 }
 0x311   : > { %v1330_v35 = vmul.f32 %v2349_v29, %v2826_v36  ;;  %v1331_v38 = vmul.f32 %v2349_v29, %v2828_v37 }
 0x312   : > { %2354 = vrsqrt.f32 %v1325_v32 }
 0x313   : > { %v1350_v41 = vmul.f32 %v1343_v30, %v1330_v35  ;;  %v1351_v42 = vmul.f32 %v1347_v34, %v1331_v38 }
 0x314   : > { %v2351_v40 = vpop.eup %2350 }
 0x315   : > { %v1332_v47 = vmul.f32 %v2351_v40, %v2834_v44  ;;  %v1333_v48 = vmul.f32 %v2351_v40, %v2836_v45  ;;  %v1371_v37 = vadd.f32 %v1367_v46, %v1351_v42  ;;  %v1370_v51 = vadd.f32 %v1363_v43, %v1350_v41 }
 0x317   : > { %v1352_v49 = vmul.f32 %v1343_v30, %v1332_v47  ;;  %v1353_v36 = vmul.f32 %v1347_v34, %v1333_v48 }
 0x318   : > { %v2353_v50 = vpop.eup %2352 }
 0x319   : > { %v1373_v52 = vadd.f32 %v1367_v46, %v1353_v36  ;;  %v1372_v55 = vadd.f32 %v1363_v43, %v1352_v49  ;;  %v1335_v56 = vmul.f32 %v2353_v50, %v2844_v54  ;;  %v1334_v57 = vmul.f32 %v2353_v50, %v2842_v53 }
 0x31b   : > { %v1379_v58 = vpack.c.bf16 %v1373_v52, %v1371_v37  ;;  %v1378_v59 = vpack.c.bf16 %v1372_v55, %v1370_v51  ;;  %v1355_v44 = vmul.f32 %v1347_v34, %v1335_v56  ;;  %v1354_v60 = vmul.f32 %v1343_v30, %v1334_v57 }
 0x31c   : > { %v2355_v31 = vpop.eup %2354 }
 0x31d   : > { %1549 = vmatprep.mubr.bf16.mxu1 %v1379_v58  ;;  %v1337_v33 = vmul.f32 %v2355_v31, %v2852_v62  ;;  %v1336_v45 = vmul.f32 %v2355_v31, %v2850_v61  ;;  %v1375_v1 = vadd.f32 %v1367_v46, %v1355_v44  ;;  %v1374_v3 = vadd.f32 %v1363_v43, %v1354_v60  ;;  %v1960_v62 = vld [vmem:[%s2949_s4] ss:$0 sm:$0xff] }
 0x31e   : > { %1550 = vmatmul.mubr.bf16.vlgmr.msra.gmra.mrb[16].mxu1 %v1378_v59 }
 0x31f   : > { %v1357_v63 = vmul.f32 %v1347_v34, %v1337_v33  ;;  %v1356_v0 = vmul.f32 %v1343_v30, %v1336_v45 }
 0x321   : > { %v1377_v2 = vadd.f32 %v1367_v46, %v1357_v63  ;;  %v1376_v4 = vadd.f32 %v1363_v43, %v1356_v0 }
 0x323   : > { %v1381_v54 = vpack.c.bf16 %v1377_v2, %v1375_v1  ;;  %v1380_v5 = vpack.c.bf16 %v1376_v4, %v1374_v3 }
 0x325   : > { %1557 = vmatprep.mubr.bf16.mxu1 %v1381_v54 }
 0x326   : > { %1558 = vmatmul.mubr.bf16.gmra.mrb[20].mxu1 %v1380_v5 }
 0x3f1   : > { %v2013_v53 = vpop.f32.mrb[16].mxu1 }
 0x3f2   : > { %v2014_v6 = vpop.f32.mrb[17].mxu1 }
 0x3f3   : > { %v2015_v7 = vadd.f32 %v2014_v6, %v2013_v53  ;;  %v2016_v61 = vpop.f32.mrb[18].mxu1 }
 0x3f4   : > { %v2017_v8 = vpop.f32.mrb[19].mxu1 }
 0x3f5   : > { %v1552_v9 = vadd.f32 %v2015_v7, %v1960_v62  ;;  %v2018_v10 = vadd.f32 %v2017_v8, %v2016_v61 }
 0x3f7   : > { %v1566_v11 = vmul.f32 0.5, %v1552_v9  ;;  %v1555_v12 = vadd.f32 %v2018_v10, %v1960_v62 }
 0x3f9   : > { %2356 = vtanh.f32 %v1566_v11  ;;  %v1567_v13 = vmul.f32 0.5, %v1555_v12  ;;  %v2019_v14 = vpop.f32.mrb[20].mxu1 }
 0x3fa   : > { %v2020_v15 = vpop.f32.mrb[21].mxu1 }
 0x3fb   : > { %2358 = vtanh.f32 %v1567_v13  ;;  %v2021_v16 = vadd.f32 %v2020_v15, %v2019_v14  ;;  %v2022_v17 = vpop.f32.mrb[22].mxu1 }
 0x3fc   : > { %v2023_v18 = vpop.f32.mrb[23].mxu1 }
 0x3fd   : > { %v1560_v19 = vadd.f32 %v2021_v16, %v1960_v62  ;;  %v2024_v20 = vadd.f32 %v2023_v18, %v2022_v17 }
 0x3ff   : > { %v1568_v21 = vmul.f32 0.5, %v1560_v19  ;;  %v1563_v22 = vadd.f32 %v2024_v20, %v1960_v62 }
 0x401   : > { %2360 = vtanh.f32 %v1568_v21  ;;  %v1569_v23 = vmul.f32 0.5, %v1563_v22 }
 0x403   : > { %v2357_v24 = vpop.eup %2356  ;;  %2362 = vtanh.f32 %v1569_v23 }
 0x404   : > { %v1574_v25 = vadd.f32 1.0, %v2357_v24 }
 0x405   : > { %v2359_v26 = vpop.eup %2358 }
 0x406   : > { %v1578_v27 = vmul.f32 0.5, %v1574_v25  ;;  %v1575_v28 = vadd.f32 1.0, %v2359_v26 }
 0x408   : > { %1583 = vst.msk [vmem:[%s2880_s14] sm:$0xff] %vm1582_vm9, %v1578_v27  ;;  %v1579_v29 = vmul.f32 0.5, %v1575_v28 }
 0x40a   : > { %1584 = vst.msk [vmem:[%s2880_s14 + $0x8] sm:$0xff] %vm1582_vm9, %v1579_v29 }
 0x40b   : > { %v2361_v30 = vpop.eup %2360 }
 0x40c   : > { %v1576_v32 = vadd.f32 1.0, %v2361_v30  ;;  %1593 = sbr.rel (!%p2971_p6) target bundleno = 1092 (0x444), region = 68 }
 0x40d   : > { %v2363_v34 = vpop.eup %2362 }
 0x40e   : > { %v1580_v35 = vmul.f32 0.5, %v1576_v32  ;;  %v1577_v38 = vadd.f32 1.0, %v2363_v34 }
 0x410   : > { %1585 = vst.msk [vmem:[%s2880_s14 + $0x10] sm:$0xff] %vm1582_vm9, %v1580_v35  ;;  %v1581_v39 = vmul.f32 0.5, %v1577_v38 }
 0x412   : > { %1586 = vst.msk [vmem:[%s2880_s14 + $0x18] sm:$0xff] %vm1582_vm9, %v1581_v39 }
 0x413   : > { %s2983_s21 = smov (!%p1596_p7, %s1595_s21), 4 }
 0x414   : > { %s1979_s15 = sshll.u32 %s2983_s21, 7 }
 0x415   : > { %p1982_p9 = scmp.eq.s32.totalorder %s1979_s15, 0 }
 0x416   : > { %s2899_s16 = sshrl.u32 (!%p1982_p9), %s2983_s21, 2 }
 0x417   : > { %1604 = sbr.rel (%p1982_p9) target bundleno = 1092 (0x444), region = 72  ;;  %p1983_p12 = scmp.le.s32.totalorder (!%p1982_p9), %s2899_s16, 0 }
 0x41e   : > { %1779 = sbr.rel (%p1983_p12) target bundleno = 1071 (0x42f), region = 154  ;;  %s2972_s9 = smov (!%p1983_p12), %s2893_s30 }
 0x41f   : > { %s2973_s17 = smov (!%p1983_p12), %s2880_s14  ;;  %s2908_s11 = smov (!%p1983_p12), 0  }
 0x420   : > { %s2532_s12 = smov (!%p1983_p12), 0  }
 0x425 LB: >> { %v1672_v40 = vld [vmem:[%s2526_s17] sm:$0xff]  ;;  %v1674_v41 = vld [vmem:[%s2526_s17 + $0x8] sm:$0xff]  ;;  %v1676_v42 = vld [vmem:[%s2526_s17 + $0x10] sm:$0xff]  ;;  %s1680_s18 = sadd.s32 1, %s2530_s11  ;;  %s1666_s12 = sadd.s32 1, %s2534_s12   ;;  %s2534_s12 = sphi %s2532_s12, %s1666_s12   ;;  %s2530_s11 = sphi %s2908_s11, %s2974_s11   ;;  %s2526_s17 = sphi %s2973_s17, %s1685_s17   ;;  %s2522_s9 = sphi %s2972_s9, %s1686_s9  }
 0x426   : >> { %1673 = vst [vmem:[%s2522_s9] sm:$0xff] %v1672_v40  ;;  %1675 = vst [vmem:[%s2522_s9 + $0x8] sm:$0xff] %v1674_v41  ;;  %v1678_v43 = vld [vmem:[%s2526_s17 + $0x18] sm:$0xff]  ;;  %p1681_p0 = scmp.ge.s32.totalorder %s1680_s18, %s2899_s16  ;;  %p1665_p1 = scmp.ge.s32.totalorder %s1666_s12, %s2899_s16 }
 0x427   : >> { %1677 = vst [vmem:[%s2522_s9 + $0x10] sm:$0xff] %v1676_v42  ;;  %1679 = vst [vmem:[%s2522_s9 + $0x18] sm:$0xff] %v1678_v43 }
 0x428   : >> { %s2985_s18 = smov (%p1681_p0, %s1680_s18), 0  ;;  %1668 = sbr.rel (!%p1665_p1) target bundleno = 1061 (0x425), region = 160 }
 0x429   : >> { %s1984_s13 = sshll.u32 %s2985_s18, 5  ;;  %s2974_s11 = smov %s2985_s18 }
 0x42a   : >> { %s1685_s17 = scalar_lea.vmem %s2880_s14, %s1984_s13 [#allocation7]   ;;  %s1686_s9 = scalar_lea.vmem %s2893_s30, %s1984_s13  }
 0x42f PF: > { %s2924_s25 = sand.u32 3, %s2983_s21   ;;  %s1995_s26 = sshll.u32 %s2899_s16, 5 }
 0x430   : > { %s1691_s27 = scalar_lea.vmem %s2880_s14, %s1995_s26 [#allocation7]   ;;  %s1693_s20 = scalar_lea.vmem %s2893_s30, %s1995_s26  }
 0x431   : > { %p1989_p4 = scmp.le.s32.totalorder %s2924_s25, 0 }
 0x432   : > { %s2536_s22 = smov (!%p1989_p4), %s1693_s20   ;;  %s2540_s19 = smov (!%p1989_p4), %s1691_s27  }
 0x433   : > { %1793 = sbr.rel (%p1989_p4) target bundleno = 1092 (0x444), region = 165  ;;  %s2544_s10 = smov (!%p1989_p4), 0  }
 0x434   : > { %s2548_s23 = smov (!%p1989_p4), 0  }
 0x43a LB: >> { %v1703_v46 = vld [vmem:[%s2542_s19] sm:$0xff]  ;;  %s1705_s21 = sadd.s32 1, %s2546_s10  ;;  %s1697_s23 = sadd.s32 1, %s2550_s23   ;;  %s2550_s23 = sphi %s2548_s23, %s1697_s23   ;;  %s2546_s10 = sphi %s2544_s10, %s2545_s10   ;;  %s2542_s19 = sphi %s2540_s19, %s1710_s19   ;;  %s2538_s22 = sphi %s2536_s22, %s1711_s22  }
 0x43b   : >> { %1704 = vst [vmem:[%s2538_s22] sm:$0xff] %v1703_v46  ;;  %p1706_p5 = scmp.ge.s32.totalorder %s1705_s21, %s2924_s25  ;;  %p1696_p8 = scmp.ge.s32.totalorder %s1697_s23, %s2924_s25 }
 0x43d   : >> { %s2987_s21 = smov (%p1706_p5, %s1705_s21), 0  ;;  %1699 = sbr.rel (!%p1696_p8) target bundleno = 1082 (0x43a), region = 171 }
 0x43e   : >> { %s1990_s14 = sshll.u32 %s2987_s21, 3  ;;  %s2545_s10 = smov %s2987_s21  }
 0x43f   : >> { %s1710_s19 = scalar_lea.vmem %s1691_s27, %s1990_s14 [#allocation7]   ;;  %s1711_s22 = scalar_lea.vmem %s1693_s20, %s1990_s14  }
 0x444 PF: > { %s2975_s30 = sld [smem:[#allocation10_spill]]  ;;  %s2976_s24 = sld [smem:[#allocation11_spill]] }
 0x445   : > { %s2977_s27 = smov %s2510_s28  ;;  %s2978_s28 = smov %s2514_s29 }
 0x44a   : > { %p19_p11 = scmp.ge.s32.totalorder %s2975_s30, 5   ;;  %s2979_s29 = smov %s2976_s24 }
 0x44c   :  { %21 = sbr.rel (!%p19_p11) target bundleno = 4 (0x4), region = 182 }
 0x453   :  { %1727 = vsyncpa [#allocation3], 1 }
 0x454   :  { %1729 = vsyncpa [#allocation3 + $0x1], 1 }
 0x455   :  { %1730 = vsyncpa [#allocation5], 1 }

</bundles_post_ra>
